<compile_context>
chip_gen: v6e
topology: v6e:2x2x1
jax: 0.10.0
libtpu: 0.0.40
codegen_flags: <defaults>
</compile_context>

<pallas_src>
import jax
import jax.numpy as jnp
from jax import lax
from jax.experimental import pallas as pl
from jax.experimental.pallas import tpu as pltpu


_LANE = 128
_SUBLANE = 8
_NEG_BIG = -1e30                      # bias for padded class lanes -> prob 0
_VMEM_CAP_BYTES = 48 * 1024 * 1024    # stay well inside v7x's 64 MiB VMEM
_VMEM_HEADROOM_BYTES = 8 * 1024 * 1024


def _round_up(x, m):
    return (x + m - 1) // m * m


def _gelu_exact(x):
    # PyTorch nn.GELU() default is the exact erf formulation.
    return 0.5 * x * (1.0 + lax.erf(x * 0.7071067811865476))


def classifier_kernel(x_ref, w1_ref, b1_ref, w2_ref, b2_ref, w3_ref, b3_ref,
                      out_ref):
    # x arrives f32 straight from HBM; cast to bf16 in-kernel (VPU) so the
    # wrapper never materializes a separate bf16/padded copy.
    x = x_ref[...].astype(jnp.bfloat16)                            # (TB, E)

    # linear1 + GELU  (bf16 MXU, f32 accumulate, f32 elementwise)
    h = jnp.dot(x, w1_ref[...], preferred_element_type=jnp.float32)
    h = _gelu_exact(h + b1_ref[...])                               # (TB, H1) f32

    # linear2 + GELU
    h = jnp.dot(h.astype(jnp.bfloat16), w2_ref[...],
                preferred_element_type=jnp.float32)
    h = _gelu_exact(h + b2_ref[...])                               # (TB, H2) f32

    # output linear (class dim padded to 128 lanes; padded-lane bias = -1e30)
    logits = jnp.dot(h.astype(jnp.bfloat16), w3_ref[...],
                     preferred_element_type=jnp.float32)
    logits = logits + b3_ref[...]                                  # (TB, C) f32

    # softmax over classes; padded lanes contribute exp(-1e30 - m) == 0.
    m = jnp.max(logits, axis=-1, keepdims=True)
    e = jnp.exp(logits - m)
    denom = jnp.sum(e, axis=-1, keepdims=True)
    probs = e / denom            # exact divide: rows sum to 1; kernel is HBM-bound

    # store only the real classes (masked vst) -> no padded writeback.
    n_classes = out_ref.shape[-1]
    out_ref[...] = probs[:, :n_classes].astype(out_ref.dtype)


def prepare_params(w1, b1, w2, b2, w3, b3):
    """Pad/cast head weights ONCE at model-load time (not per forward call).

    Weights are (in_features, out_features). Hidden/class dims are zero-padded
    to lane-128 multiples (exact for hidden layers: GELU(0)=0 feeds zero rows
    of the next weight); the output pad bias is -1e30 so padded classes get
    probability 0. Returns (padded param tuple, n_classes).
    """
    E, h1 = w1.shape
    h2 = w2.shape[1]
    n_classes = w3.shape[1]
    H1 = _round_up(h1, _LANE)
    H2 = _round_up(h2, _LANE)
    C = _round_up(n_classes, _LANE)

    w1p = jnp.zeros((E, H1), jnp.bfloat16).at[:, :h1].set(w1.astype(jnp.bfloat16))
    b1p = jnp.zeros((1, H1), jnp.float32).at[:, :h1].set(
        b1.reshape(1, -1).astype(jnp.float32))
    w2p = jnp.zeros((H1, H2), jnp.bfloat16).at[:h1, :h2].set(w2.astype(jnp.bfloat16))
    b2p = jnp.zeros((1, H2), jnp.float32).at[:, :h2].set(
        b2.reshape(1, -1).astype(jnp.float32))
    w3p = jnp.zeros((H2, C), jnp.bfloat16).at[:h2, :n_classes].set(
        w3.astype(jnp.bfloat16))
    b3p = jnp.full((1, C), _NEG_BIG, jnp.float32).at[:, :n_classes].set(
        b3.reshape(1, -1).astype(jnp.float32))
    return (w1p, b1p, w2p, b2p, w3p, b3p), n_classes


def _footprint_bytes(tb, E, H1, H2, C, n_classes):
    # Conservative: weights counted double-buffered (covers the fallback path).
    weights = 2 * ((E * H1 + H1 * H2 + H2 * C) * 2 + (H1 + H2 + C) * 4)
    io = 2 * tb * E * 4 + 2 * tb * n_classes * 4     # double-buffered x / out tiles
    acts = tb * (H1 + H2 + C) * 4                    # f32 intermediates
    return weights + io + acts


def _pick_batch_tile(B, block_b, E, H1, H2, C, n_classes):
    if B >= 16:
        # At least two grid steps so the "parallel" batch axis can shard across
        # both v7x TensorCores (no effect on single-TC v5e/v6e).
        tb = _round_up((B + 1) // 2, _SUBLANE)
    else:
        tb = _round_up(max(B, 1), _SUBLANE)
    tb = min(_round_up(block_b, _SUBLANE), tb)
    while tb > _SUBLANE and _footprint_bytes(tb, E, H1, H2, C, n_classes) > (
            _VMEM_CAP_BYTES - _VMEM_HEADROOM_BYTES):
        tb = _round_up(tb // 2, _SUBLANE)
    return tb


def sentence_classifier_head(x, params, n_classes, *, block_b=1024):
    """x: (B, E) float embeddings; params from prepare_params(); -> (B, n_classes) f32."""
    w1p, b1p, w2p, b2p, w3p, b3p = params
    B, E = x.shape
    H1, H2, C = w1p.shape[1], w2p.shape[1], w3p.shape[1]

    tb = _pick_batch_tile(B, block_b, E, H1, H2, C, n_classes)
    grid = (pl.cdiv(B, tb),)
    vmem_limit = max(
        16 << 20,
        min(_VMEM_CAP_BYTES,
            _footprint_bytes(tb, E, H1, H2, C, n_classes) + _VMEM_HEADROOM_BYTES))

    const = lambda i: (0, 0)

    def build_call(single_buffer_weights):
        if single_buffer_weights:
            # Constant-index weights never change across grid steps; a single
            # VMEM buffer halves their resident footprint (matters at large E
            # on v7x's 64 MiB VMEM).
            wspec = lambda shape: pl.BlockSpec(shape, const,
                                               pipeline_mode=pl.Buffered(1))
        else:
            wspec = lambda shape: pl.BlockSpec(shape, const)
        return pl.pallas_call(
            classifier_kernel,
            out_shape=jax.ShapeDtypeStruct((B, n_classes), jnp.float32),
            grid=grid,
            in_specs=[
                pl.BlockSpec((tb, E), lambda i: (i, 0)),   # pipelined per batch tile
                wspec((E, H1)), wspec((1, H1)),            # weights: VMEM-resident
                wspec((H1, H2)), wspec((1, H2)),
                wspec((H2, C)), wspec((1, C)),
            ],
            out_specs=pl.BlockSpec((tb, n_classes), lambda i: (i, 0)),
            compiler_params=pltpu.CompilerParams(
                dimension_semantics=("parallel",),
                vmem_limit_bytes=vmem_limit),
        )

    args = (x, w1p, b1p, w2p, b2p, w3p, b3p)
    try:
        return build_call(True)(*args)
    except Exception:
        # Fallback for Pallas versions that reject pl.Buffered(1) on top-level
        # pallas_call BlockSpecs: default double buffering (identical math).
        return build_call(False)(*args)


def _init_params(key, embedding_size, n_classes):
    e, h1, h2 = embedding_size, embedding_size // 2, embedding_size // 4
    ks = jax.random.split(key, 6)

    def lin(kw, kb, fan_in, fan_out):
        bound = 1.0 / (fan_in ** 0.5)
        w = jax.random.uniform(kw, (fan_in, fan_out), jnp.float32, -bound, bound)
        b = jax.random.uniform(kb, (fan_out,), jnp.float32, -bound, bound)
        return w, b

    w1, b1 = lin(ks[0], ks[1], e, h1)
    w2, b2 = lin(ks[2], ks[3], h1, h2)
    w3, b3 = lin(ks[4], ks[5], h2, n_classes)
    return w1, b1, w2, b2, w3, b3


if __name__ == "__main__":
    # TODO(synk): the text encoder (CustomSentenceTransformer) operates on raw
    # strings and is not expressible as a Pallas kernel; precomputed sentence
    # embeddings are fed directly to the classification head.
    batch = 8
    embedding_size = 128
    n_classes = 4

    key = jax.random.PRNGKey(0)
    k_x, k_p = jax.random.split(key)
    x = jax.random.normal(k_x, (batch, embedding_size), jnp.float32)
    w1, b1, w2, b2, w3, b3 = _init_params(k_p, embedding_size, n_classes)

    # One-time weight prep (pad to lane-128, cast to bf16) — NOT per call.
    params, n_cls = prepare_params(w1, b1, w2, b2, w3, b3)

    probs = sentence_classifier_head(x, params, n_cls)
    probs = jax.block_until_ready(probs)

    # Pure-JAX f32 reference (tolerance relaxed for bf16 matmul operands).
    def ref(xx):
        h = _gelu_exact(xx @ w1 + b1.reshape(1, -1))
        h = _gelu_exact(h @ w2 + b2.reshape(1, -1))
        logits = h @ w3 + b3.reshape(1, -1)
        return jax.nn.softmax(logits, axis=-1)

    expected = ref(x)
    assert probs.shape == (batch, n_classes)
    assert jnp.allclose(jnp.sum(probs, axis=-1), 1.0, atol=5e-3)
    assert jnp.allclose(probs, expected, atol=3e-2)
    print("KERNEL_OK")
</pallas_src>

<mosaic_0001>
module attributes {stable_mosaic.version = 11 : i64} {
  func.func @classifier_kernel(%arg0: i32, %arg1: memref<8x128xf32, #tpu.memory_space<vmem>>, %arg2: memref<128x128xbf16, #tpu.memory_space<vmem>>, %arg3: memref<1x128xf32, #tpu.memory_space<vmem>>, %arg4: memref<128x128xbf16, #tpu.memory_space<vmem>>, %arg5: memref<1x128xf32, #tpu.memory_space<vmem>>, %arg6: memref<128x128xbf16, #tpu.memory_space<vmem>>, %arg7: memref<1x128xf32, #tpu.memory_space<vmem>>, %arg8: memref<8x4xf32, #tpu.memory_space<vmem>>) attributes {dimension_semantics = [#tpu.dimension_semantics<parallel>], iteration_bounds = array<i64: 1>, scalar_prefetch = 0 : i64, scratch_operands = 0 : i64, tpu.core_type = #tpu.core_type<tc>, window_params = [{transform_indices = @transform_0, window_bounds = array<i64: 8, 128>}, {pipeline_mode = #tpu.pipeline_mode<synchronous>, transform_indices = @transform_1, window_bounds = array<i64: 128, 128>}, {pipeline_mode = #tpu.pipeline_mode<synchronous>, transform_indices = @transform_2, window_bounds = array<i64: 1, 128>}, {pipeline_mode = #tpu.pipeline_mode<synchronous>, transform_indices = @transform_3, window_bounds = array<i64: 128, 128>}, {pipeline_mode = #tpu.pipeline_mode<synchronous>, transform_indices = @transform_4, window_bounds = array<i64: 1, 128>}, {pipeline_mode = #tpu.pipeline_mode<synchronous>, transform_indices = @transform_5, window_bounds = array<i64: 128, 128>}, {pipeline_mode = #tpu.pipeline_mode<synchronous>, transform_indices = @transform_6, window_bounds = array<i64: 1, 128>}, {transform_indices = @transform_7, window_bounds = array<i64: 8, 4>}]} {
    %c0 = arith.constant 0 : index
    %c0_0 = arith.constant 0 : index
    %0 = vector.load %arg1[%c0, %c0_0] : memref<8x128xf32, #tpu.memory_space<vmem>>, vector<8x128xf32>
    %1 = arith.truncf %0 : vector<8x128xf32> to vector<8x128xbf16>
    %c0_1 = arith.constant 0 : index
    %c0_2 = arith.constant 0 : index
    %2 = vector.load %arg2[%c0_1, %c0_2] : memref<128x128xbf16, #tpu.memory_space<vmem>>, vector<128x128xbf16>
    %cst = arith.constant dense<0.000000e+00> : vector<8x128xf32>
    %3 = tpu.matmul %1, %2, %cst {dimension_numbers = #tpu.dot_dimension_numbers<[1], [0], [0], [1], [0, 0, 1, 1], [], []>} : vector<8x128xbf16>, vector<128x128xbf16>, vector<8x128xf32> -> vector<8x128xf32>
    %c0_3 = arith.constant 0 : index
    %c0_4 = arith.constant 0 : index
    %4 = vector.load %arg3[%c0_3, %c0_4] : memref<1x128xf32, #tpu.memory_space<vmem>>, vector<1x128xf32>
    %5 = vector.broadcast %4 : vector<1x128xf32> to vector<8x128xf32>
    %6 = arith.addf %3, %5 : vector<8x128xf32>
    %cst_5 = arith.constant 5.000000e-01 : f32
    %7 = vector.broadcast %cst_5 : f32 to vector<8x128xf32>
    %8 = arith.mulf %7, %6 : vector<8x128xf32>
    %cst_6 = arith.constant 0.707106769 : f32
    %9 = vector.broadcast %cst_6 : f32 to vector<8x128xf32>
    %10 = arith.mulf %6, %9 : vector<8x128xf32>
    %11 = math.erf %10 : vector<8x128xf32>
    %cst_7 = arith.constant 1.000000e+00 : f32
    %12 = vector.broadcast %cst_7 : f32 to vector<8x128xf32>
    %13 = arith.addf %12, %11 : vector<8x128xf32>
    %14 = arith.mulf %8, %13 : vector<8x128xf32>
    %15 = arith.truncf %14 : vector<8x128xf32> to vector<8x128xbf16>
    %c0_8 = arith.constant 0 : index
    %c0_9 = arith.constant 0 : index
    %16 = vector.load %arg4[%c0_8, %c0_9] : memref<128x128xbf16, #tpu.memory_space<vmem>>, vector<128x128xbf16>
    %cst_10 = arith.constant dense<0.000000e+00> : vector<8x128xf32>
    %17 = tpu.matmul %15, %16, %cst_10 {dimension_numbers = #tpu.dot_dimension_numbers<[1], [0], [0], [1], [0, 0, 1, 1], [], []>} : vector<8x128xbf16>, vector<128x128xbf16>, vector<8x128xf32> -> vector<8x128xf32>
    %c0_11 = arith.constant 0 : index
    %c0_12 = arith.constant 0 : index
    %18 = vector.load %arg5[%c0_11, %c0_12] : memref<1x128xf32, #tpu.memory_space<vmem>>, vector<1x128xf32>
    %19 = vector.broadcast %18 : vector<1x128xf32> to vector<8x128xf32>
    %20 = arith.addf %17, %19 : vector<8x128xf32>
    %cst_13 = arith.constant 5.000000e-01 : f32
    %21 = vector.broadcast %cst_13 : f32 to vector<8x128xf32>
    %22 = arith.mulf %21, %20 : vector<8x128xf32>
    %cst_14 = arith.constant 0.707106769 : f32
    %23 = vector.broadcast %cst_14 : f32 to vector<8x128xf32>
    %24 = arith.mulf %20, %23 : vector<8x128xf32>
    %25 = math.erf %24 : vector<8x128xf32>
    %cst_15 = arith.constant 1.000000e+00 : f32
    %26 = vector.broadcast %cst_15 : f32 to vector<8x128xf32>
    %27 = arith.addf %26, %25 : vector<8x128xf32>
    %28 = arith.mulf %22, %27 : vector<8x128xf32>
    %29 = arith.truncf %28 : vector<8x128xf32> to vector<8x128xbf16>
    %c0_16 = arith.constant 0 : index
    %c0_17 = arith.constant 0 : index
    %30 = vector.load %arg6[%c0_16, %c0_17] : memref<128x128xbf16, #tpu.memory_space<vmem>>, vector<128x128xbf16>
    %cst_18 = arith.constant dense<0.000000e+00> : vector<8x128xf32>
    %31 = tpu.matmul %29, %30, %cst_18 {dimension_numbers = #tpu.dot_dimension_numbers<[1], [0], [0], [1], [0, 0, 1, 1], [], []>} : vector<8x128xbf16>, vector<128x128xbf16>, vector<8x128xf32> -> vector<8x128xf32>
    %c0_19 = arith.constant 0 : index
    %c0_20 = arith.constant 0 : index
    %32 = vector.load %arg7[%c0_19, %c0_20] : memref<1x128xf32, #tpu.memory_space<vmem>>, vector<1x128xf32>
    %33 = vector.broadcast %32 : vector<1x128xf32> to vector<8x128xf32>
    %34 = arith.addf %31, %33 : vector<8x128xf32>
    %cst_21 = arith.constant dense<0xFF800000> : vector<8xf32>
    %35 = vector.multi_reduction <maximumf>, %34, %cst_21 [1] : vector<8x128xf32> to vector<8xf32>
    %36 = vector.shape_cast %35 : vector<8xf32> to vector<8x1xf32>
    %37 = vector.broadcast %36 : vector<8x1xf32> to vector<8x128xf32>
    %38 = arith.subf %34, %37 : vector<8x128xf32>
    %39 = math.exp %38 : vector<8x128xf32>
    %cst_22 = arith.constant dense<0.000000e+00> : vector<8xf32>
    %40 = vector.multi_reduction <add>, %39, %cst_22 [1] : vector<8x128xf32> to vector<8xf32>
    %41 = vector.shape_cast %40 : vector<8xf32> to vector<8x1xf32>
    %42 = vector.broadcast %41 : vector<8x1xf32> to vector<8x128xf32>
    %43 = arith.divf %39, %42 : vector<8x128xf32>
    %44 = vector.extract_strided_slice %43 {offsets = [0, 0], sizes = [8, 4], strides = [1, 1]} : vector<8x128xf32> to vector<8x4xf32>
    %c0_23 = arith.constant 0 : index
    %c0_24 = arith.constant 0 : index
    %45 = vector.load %arg8[%c0_23, %c0_24] : memref<8x4xf32, #tpu.memory_space<vmem>>, vector<8x4xf32>
    tpu.vector_store %arg8[%c0_23, %c0_24], %44 {strides = array<i32>} : memref<8x4xf32, #tpu.memory_space<vmem>>, vector<8x4xf32>,
    return
  }
  func.func @transform_0(%arg0: i32) -> (i32, i32) {
    %c0_i32 = arith.constant 0 : i32
    %c0_i32_0 = arith.constant 0 : i32
    return %arg0, %c0_i32 : i32, i32
  }
  func.func @transform_1(%arg0: i32) -> (i32, i32) {
    %c0_i32 = arith.constant 0 : i32
    %c0_i32_0 = arith.constant 0 : i32
    %c0_i32_1 = arith.constant 0 : i32
    return %c0_i32, %c0_i32_0 : i32, i32
  }
  func.func @transform_2(%arg0: i32) -> (i32, i32) {
    %c0_i32 = arith.constant 0 : i32
    %c0_i32_0 = arith.constant 0 : i32
    %c0_i32_1 = arith.constant 0 : i32
    return %c0_i32, %c0_i32_0 : i32, i32
  }
  func.func @transform_3(%arg0: i32) -> (i32, i32) {
    %c0_i32 = arith.constant 0 : i32
    %c0_i32_0 = arith.constant 0 : i32
    %c0_i32_1 = arith.constant 0 : i32
    return %c0_i32, %c0_i32_0 : i32, i32
  }
  func.func @transform_4(%arg0: i32) -> (i32, i32) {
    %c0_i32 = arith.constant 0 : i32
    %c0_i32_0 = arith.constant 0 : i32
    %c0_i32_1 = arith.constant 0 : i32
    return %c0_i32, %c0_i32_0 : i32, i32
  }
  func.func @transform_5(%arg0: i32) -> (i32, i32) {
    %c0_i32 = arith.constant 0 : i32
    %c0_i32_0 = arith.constant 0 : i32
    %c0_i32_1 = arith.constant 0 : i32
    return %c0_i32, %c0_i32_0 : i32, i32
  }
  func.func @transform_6(%arg0: i32) -> (i32, i32) {
    %c0_i32 = arith.constant 0 : i32
    %c0_i32_0 = arith.constant 0 : i32
    %c0_i32_1 = arith.constant 0 : i32
    return %c0_i32, %c0_i32_0 : i32, i32
  }
  func.func @transform_7(%arg0: i32) -> (i32, i32) {
    %c0_i32 = arith.constant 0 : i32
    %c0_i32_0 = arith.constant 0 : i32
    return %arg0, %c0_i32 : i32, i32
  }
}

module attributes {stable_mosaic.version = 11 : i64} {
  func.func @classifier_kernel(%arg0: i32, %arg1: memref<8x128xf32, #tpu.memory_space<vmem>>, %arg2: memref<128x128xbf16, #tpu.memory_space<vmem>>, %arg3: memref<1x128xf32, #tpu.memory_space<vmem>>, %arg4: memref<128x128xbf16, #tpu.memory_space<vmem>>, %arg5: memref<1x128xf32, #tpu.memory_space<vmem>>, %arg6: memref<128x128xbf16, #tpu.memory_space<vmem>>, %arg7: memref<1x128xf32, #tpu.memory_space<vmem>>, %arg8: memref<8x4xf32, #tpu.memory_space<vmem>>) attributes {dimension_semantics = [#tpu.dimension_semantics<parallel>], iteration_bounds = array<i64: 1>, scalar_prefetch = 0 : i64, scratch_operands = 0 : i64, tpu.core_type = #tpu.core_type<tc>, window_params = [{transform_indices = @transform_0, window_bounds = array<i64: 8, 128>}, {pipeline_mode = #tpu.pipeline_mode<synchronous>, transform_indices = @transform_1, window_bounds = array<i64: 128, 128>}, {pipeline_mode = #tpu.pipeline_mode<synchronous>, transform_indices = @transform_2, window_bounds = array<i64: 1, 128>}, {pipeline_mode = #tpu.pipeline_mode<synchronous>, transform_indices = @transform_3, window_bounds = array<i64: 128, 128>}, {pipeline_mode = #tpu.pipeline_mode<synchronous>, transform_indices = @transform_4, window_bounds = array<i64: 1, 128>}, {pipeline_mode = #tpu.pipeline_mode<synchronous>, transform_indices = @transform_5, window_bounds = array<i64: 128, 128>}, {pipeline_mode = #tpu.pipeline_mode<synchronous>, transform_indices = @transform_6, window_bounds = array<i64: 1, 128>}, {transform_indices = @transform_7, window_bounds = array<i64: 8, 4>}]} {
    %c0 = arith.constant 0 : index
    %c0_0 = arith.constant 0 : index
    %0 = vector.load %arg1[%c0, %c0_0] : memref<8x128xf32, #tpu.memory_space<vmem>>, vector<8x128xf32>
    %1 = arith.truncf %0 : vector<8x128xf32> to vector<8x128xbf16>
    %c0_1 = arith.constant 0 : index
    %c0_2 = arith.constant 0 : index
    %2 = vector.load %arg2[%c0_1, %c0_2] : memref<128x128xbf16, #tpu.memory_space<vmem>>, vector<128x128xbf16>
    %cst = arith.constant dense<0.000000e+00> : vector<8x128xf32>
    %3 = tpu.matmul %1, %2, %cst {dimension_numbers = #tpu.dot_dimension_numbers<[1], [0], [0], [1], [0, 0, 1, 1], [], []>} : vector<8x128xbf16>, vector<128x128xbf16>, vector<8x128xf32> -> vector<8x128xf32>
    %c0_3 = arith.constant 0 : index
    %c0_4 = arith.constant 0 : index
    %4 = vector.load %arg3[%c0_3, %c0_4] : memref<1x128xf32, #tpu.memory_space<vmem>>, vector<1x128xf32>
    %5 = vector.broadcast %4 : vector<1x128xf32> to vector<8x128xf32>
    %6 = arith.addf %3, %5 : vector<8x128xf32>
    %cst_5 = arith.constant 5.000000e-01 : f32
    %7 = vector.broadcast %cst_5 : f32 to vector<8x128xf32>
    %8 = arith.mulf %7, %6 : vector<8x128xf32>
    %cst_6 = arith.constant 0.707106769 : f32
    %9 = vector.broadcast %cst_6 : f32 to vector<8x128xf32>
    %10 = arith.mulf %6, %9 : vector<8x128xf32>
    %11 = math.erf %10 : vector<8x128xf32>
    %cst_7 = arith.constant 1.000000e+00 : f32
    %12 = vector.broadcast %cst_7 : f32 to vector<8x128xf32>
    %13 = arith.addf %12, %11 : vector<8x128xf32>
    %14 = arith.mulf %8, %13 : vector<8x128xf32>
    %15 = arith.truncf %14 : vector<8x128xf32> to vector<8x128xbf16>
    %c0_8 = arith.constant 0 : index
    %c0_9 = arith.constant 0 : index
    %16 = vector.load %arg4[%c0_8, %c0_9] : memref<128x128xbf16, #tpu.memory_space<vmem>>, vector<128x128xbf16>
    %cst_10 = arith.constant dense<0.000000e+00> : vector<8x128xf32>
    %17 = tpu.matmul %15, %16, %cst_10 {dimension_numbers = #tpu.dot_dimension_numbers<[1], [0], [0], [1], [0, 0, 1, 1], [], []>} : vector<8x128xbf16>, vector<128x128xbf16>, vector<8x128xf32> -> vector<8x128xf32>
    %c0_11 = arith.constant 0 : index
    %c0_12 = arith.constant 0 : index
    %18 = vector.load %arg5[%c0_11, %c0_12] : memref<1x128xf32, #tpu.memory_space<vmem>>, vector<1x128xf32>
    %19 = vector.broadcast %18 : vector<1x128xf32> to vector<8x128xf32>
    %20 = arith.addf %17, %19 : vector<8x128xf32>
    %cst_13 = arith.constant 5.000000e-01 : f32
    %21 = vector.broadcast %cst_13 : f32 to vector<8x128xf32>
    %22 = arith.mulf %21, %20 : vector<8x128xf32>
    %cst_14 = arith.constant 0.707106769 : f32
    %23 = vector.broadcast %cst_14 : f32 to vector<8x128xf32>
    %24 = arith.mulf %20, %23 : vector<8x128xf32>
    %25 = math.erf %24 : vector<8x128xf32>
    %cst_15 = arith.constant 1.000000e+00 : f32
    %26 = vector.broadcast %cst_15 : f32 to vector<8x128xf32>
    %27 = arith.addf %26, %25 : vector<8x128xf32>
    %28 = arith.mulf %22, %27 : vector<8x128xf32>
    %29 = arith.truncf %28 : vector<8x128xf32> to vector<8x128xbf16>
    %c0_16 = arith.constant 0 : index
    %c0_17 = arith.constant 0 : index
    %30 = vector.load %arg6[%c0_16, %c0_17] : memref<128x128xbf16, #tpu.memory_space<vmem>>, vector<128x128xbf16>
    %cst_18 = arith.constant dense<0.000000e+00> : vector<8x128xf32>
    %31 = tpu.matmul %29, %30, %cst_18 {dimension_numbers = #tpu.dot_dimension_numbers<[1], [0], [0], [1], [0, 0, 1, 1], [], []>} : vector<8x128xbf16>, vector<128x128xbf16>, vector<8x128xf32> -> vector<8x128xf32>
    %c0_19 = arith.constant 0 : index
    %c0_20 = arith.constant 0 : index
    %32 = vector.load %arg7[%c0_19, %c0_20] : memref<1x128xf32, #tpu.memory_space<vmem>>, vector<1x128xf32>
    %33 = vector.broadcast %32 : vector<1x128xf32> to vector<8x128xf32>
    %34 = arith.addf %31, %33 : vector<8x128xf32>
    %cst_21 = arith.constant dense<0xFF800000> : vector<8xf32>
    %35 = vector.multi_reduction <maximumf>, %34, %cst_21 [1] : vector<8x128xf32> to vector<8xf32>
    %36 = vector.shape_cast %35 : vector<8xf32> to vector<8x1xf32>
    %37 = vector.broadcast %36 : vector<8x1xf32> to vector<8x128xf32>
    %38 = arith.subf %34, %37 : vector<8x128xf32>
    %39 = math.exp %38 : vector<8x128xf32>
    %cst_22 = arith.constant dense<0.000000e+00> : vector<8xf32>
    %40 = vector.multi_reduction <add>, %39, %cst_22 [1] : vector<8x128xf32> to vector<8xf32>
    %41 = vector.shape_cast %40 : vector<8xf32> to vector<8x1xf32>
    %42 = vector.broadcast %41 : vector<8x1xf32> to vector<8x128xf32>
    %43 = arith.divf %39, %42 : vector<8x128xf32>
    %44 = vector.extract_strided_slice %43 {offsets = [0, 0], sizes = [8, 4], strides = [1, 1]} : vector<8x128xf32> to vector<8x4xf32>
    %c0_23 = arith.constant 0 : index
    %c0_24 = arith.constant 0 : index
    %45 = vector.load %arg8[%c0_23, %c0_24] : memref<8x4xf32, #tpu.memory_space<vmem>>, vector<8x4xf32>
    tpu.vector_store %arg8[%c0_23, %c0_24], %44 {strides = array<i32>} : memref<8x4xf32, #tpu.memory_space<vmem>>, vector<8x4xf32>,
    return
  }
  func.func @transform_0(%arg0: i32) -> (i32, i32) {
    %c0_i32 = arith.constant 0 : i32
    %c0_i32_0 = arith.constant 0 : i32
    return %arg0, %c0_i32 : i32, i32
  }
  func.func @transform_1(%arg0: i32) -> (i32, i32) {
    %c0_i32 = arith.constant 0 : i32
    %c0_i32_0 = arith.constant 0 : i32
    %c0_i32_1 = arith.constant 0 : i32
    return %c0_i32, %c0_i32_0 : i32, i32
  }
  func.func @transform_2(%arg0: i32) -> (i32, i32) {
    %c0_i32 = arith.constant 0 : i32
    %c0_i32_0 = arith.constant 0 : i32
    %c0_i32_1 = arith.constant 0 : i32
    return %c0_i32, %c0_i32_0 : i32, i32
  }
  func.func @transform_3(%arg0: i32) -> (i32, i32) {
    %c0_i32 = arith.constant 0 : i32
    %c0_i32_0 = arith.constant 0 : i32
    %c0_i32_1 = arith.constant 0 : i32
    return %c0_i32, %c0_i32_0 : i32, i32
  }
  func.func @transform_4(%arg0: i32) -> (i32, i32) {
    %c0_i32 = arith.constant 0 : i32
    %c0_i32_0 = arith.constant 0 : i32
    %c0_i32_1 = arith.constant 0 : i32
    return %c0_i32, %c0_i32_0 : i32, i32
  }
  func.func @transform_5(%arg0: i32) -> (i32, i32) {
    %c0_i32 = arith.constant 0 : i32
    %c0_i32_0 = arith.constant 0 : i32
    %c0_i32_1 = arith.constant 0 : i32
    return %c0_i32, %c0_i32_0 : i32, i32
  }
  func.func @transform_6(%arg0: i32) -> (i32, i32) {
    %c0_i32 = arith.constant 0 : i32
    %c0_i32_0 = arith.constant 0 : i32
    %c0_i32_1 = arith.constant 0 : i32
    return %c0_i32, %c0_i32_0 : i32, i32
  }
  func.func @transform_7(%arg0: i32) -> (i32, i32) {
    %c0_i32 = arith.constant 0 : i32
    %c0_i32_0 = arith.constant 0 : i32
    return %arg0, %c0_i32 : i32, i32
  }
}

</mosaic_0001>

<bundles_post_ra>
// kernel: tpu_custom_call.1
= control target key start
LH: loop header
LB: loop body
LE: loop exit
PB: predicated region body
PF: predicated region fallthrough
CT: control target
= control target key end

     0   :  { %12 = vsyncpa [#allocation3], 0  ;;  %s796_s0 = inlined_call_operand.hbm [shape: f32[8,128], index: 0, kind: input, shape index: {}]   ;;  %s797_s1 = inlined_call_operand.hbm [shape: bf16[128,128], index: 1, kind: input, shape index: {}]   ;;  %s798_s2 = inlined_call_operand.vmem [shape: f32[1,128], index: 2, kind: input, shape index: {}]   ;;  %s799_s3 = inlined_call_operand.hbm [shape: bf16[128,128], index: 3, kind: input, shape index: {}]   ;;  %s800_s4 = inlined_call_operand.vmem [shape: f32[1,128], index: 4, kind: input, shape index: {}]   ;;  %s801_s5 = inlined_call_operand.hbm [shape: bf16[128,128], index: 5, kind: input, shape index: {}]   ;;  %s802_s6 = inlined_call_operand.vmem [shape: f32[1,128], index: 6, kind: input, shape index: {}]   ;;  %s803_s7 = inlined_call_operand.vmem [shape: f32[8,4], index: 7, kind: output, shape index: {}]  }
   0x1   :  { %13 = vsyncpa [#allocation5], 0 }
   0x2   :  { %14 = vsyncpa [#allocation8], 0  ;;  %s685_s24 = smov [#allocation4]  }
   0x3   :  { %s30_s25 = sshll.u32 %s685_s24, 4  ;;  %s31_s25 = int_to_ptr.vmem [resolvable:$true] %s30_s25 }
   0x4   :  { %s607_s26 = scalar_lea.vmem %s31_s25, 1024  ;;  %p612_p1 = scmp.lt.s32.totalorder %s31_s25, %s31_s25 }
   0x5   :  { %p608_p0 = scmp.ne.s32.totalorder %s31_s25, %s607_s26  ;;  %p613_p2 = scmp.lt.s32.totalorder %s607_s26, %s607_s26 }
   0x7   :  { %p614_p3 = por %p613_p2, %p612_p1 }
   0x9   :  { %p615_p4 = pnand %p614_p3, %p608_p0 }
   0xb   :  { %618 = shalt.err (!%p615_p4)
}
   0xc   :  { %s686_s27 = smov 64   ;;  %s687_s28 = smov 4  }
   0xd   :  { %36 = dma.hbm_to_vmem [thread:$0]  %s797_s1, 1024, %s31_s25, [#allocation5], %s686_s27, %s686_s27, %s687_s28  }
   0xe   :  { %s688_s8 = smov [#allocation2]   ;;  %s689_s10 = smov [#allocation6]  }
   0xf   :  { %s21_s9 = sshll.u32 %s688_s8, 4  ;;  %s44_s11 = sshll.u32 %s689_s10, 4  ;;  %s22_s9 = int_to_ptr.vmem [resolvable:$true] %s21_s9  ;;  %s45_s11 = int_to_ptr.vmem [resolvable:$true] %s44_s11 }
  0x10   :  { %s627_s12 = scalar_lea.vmem %s22_s9, 128  ;;  %p632_p6 = scmp.lt.s32.totalorder %s22_s9, %s22_s9 }
  0x11   :  { %p628_p5 = scmp.ne.s32.totalorder %s22_s9, %s627_s12  ;;  %p633_p7 = scmp.lt.s32.totalorder %s627_s12, %s627_s12 }
  0x13   :  { %p634_p8 = por %p633_p7, %p632_p6 }
  0x15   :  { %p635_p9 = pnand %p634_p8, %p628_p5 }
  0x17   :  { %638 = shalt.err (!%p635_p9)
}
  0x18   :  { %24 = dma.hbm_to_vmem [thread:$0]  %s796_s0, 128, %s22_s9, [#allocation3]  }
  0x19   :  { %s647_s15 = scalar_lea.vmem %s45_s11, 1024  ;;  %p652_p11 = scmp.lt.s32.totalorder %s45_s11, %s45_s11 }
  0x1a   :  { %p648_p10 = scmp.ne.s32.totalorder %s45_s11, %s647_s15  ;;  %p653_p12 = scmp.lt.s32.totalorder %s647_s15, %s647_s15 }
  0x1c   :  { %p654_p13 = por %p653_p12, %p652_p11 }
  0x1e   :  { %p655_p0 = pnand %p654_p13, %p648_p10 }
  0x20   :  { %658 = shalt.err (!%p655_p0)
}
  0x21   :  { %50 = dma.hbm_to_vmem [thread:$0]  %s799_s3, 1024, %s45_s11, [#allocation5], %s686_s27, %s686_s27, %s687_s28  }
  0x22   :  { %s690_s17 = smov [#allocation7]  }
  0x23   :  { %s58_s18 = sshll.u32 %s690_s17, 4  ;;  %s59_s18 = int_to_ptr.vmem [resolvable:$true] %s58_s18 }
  0x24   :  { %s667_s19 = scalar_lea.vmem %s59_s18, 1024  ;;  %p672_p2 = scmp.lt.s32.totalorder %s59_s18, %s59_s18 }
  0x25   :  { %p668_p1 = scmp.ne.s32.totalorder %s59_s18, %s667_s19  ;;  %p673_p3 = scmp.lt.s32.totalorder %s667_s19, %s667_s19 }
  0x27   :  { %p674_p4 = por %p673_p3, %p672_p2 }
  0x29   :  { %p675_p5 = pnand %p674_p4, %p668_p1 }
  0x2b   :  { %678 = shalt.err (!%p675_p5)
}
  0x2c   :  { %64 = dma.hbm_to_vmem [thread:$0]  %s801_s5, 1024, %s59_s18, [#allocation8], %s686_s27, %s686_s27, %s687_s28  }
  0x2d   :  { %679 = dma.done.wait [#allocation3], 128  }
  0x2e   :  { %680 = vsyncadd [#allocation3], 4294967168 }
  0x2f   :  { %681 = dma.done.wait [#allocation5], 2048  }
  0x30   :  { %682 = vsyncadd [#allocation5], 4294965248 }
  0x31   :  { %683 = dma.done.wait [#allocation8], 1024  }
  0x32   :  { %684 = vsyncadd [#allocation8], 4294966272  ;;  %v691_v0 = vmov 0.0   ;;  %vm692_vm0 = vmmov 0   ;;  %v567_v1 = vld [vmem:[#allocation4 + $0x38] sm:$0xff]   ;;  %v568_v2 = vld [vmem:[#allocation4 + $0x30] sm:$0xff]  }
  0x33   :  { %499 = vmatprep.subr.bf16.mxu0 %v691_v0  ;;  %515 = vmatprep.mubr.msk.bf16.mxu0 %vm692_vm0, %v691_v0  ;;  %v569_v3 = vld [vmem:[#allocation4 + $0x28] sm:$0xff]   ;;  %v575_v4 = vld [vmem:[#allocation6 + $0x38] sm:$0xff]   ;;  %v570_v5 = vld [vmem:[#allocation4 + $0x20] sm:$0xff]   ;;  %vm436_vm1 = vcmask 31744  }
  0x34   :  { %519 = vmatprep.subr.bf16.mxu1 %v691_v0  ;;  %535 = vmatprep.mubr.msk.bf16.mxu1 %vm692_vm0, %v691_v0  ;;  %v576_v6 = vld [vmem:[#allocation6 + $0x30] sm:$0xff]   ;;  %v571_v7 = vld [vmem:[#allocation4 + $0x18] sm:$0xff]   ;;  %v573_v9 = vld [vmem:[#allocation4 + $0x8] sm:$0xff]  }
  0x35   :  { %500 = vmatpush3.bf16.msra.mxu0 %v567_v1  ;;  %520 = vmatpush3.bf16.msra.mxu1 %v575_v4  ;;  %v572_v8 = vld [vmem:[#allocation4 + $0x10] sm:$0xff]   ;;  %v574_v10 = vld [vmem:[#allocation4] sm:$0xff]   ;;  %v80_v11 = vld [vmem:[#allocation2] sm:$0xff] }
  0x36   :  { %501 = vmatprep.subr.bf16.mxu0 %v691_v0  ;;  %521 = vmatprep.subr.bf16.mxu1 %v691_v0  ;;  %v81_v12 = vpack.c.bf16 %v80_v11, %v80_v11  ;;  %v577_v13 = vld [vmem:[#allocation6 + $0x28] sm:$0xff]   ;;  %v578_v14 = vld [vmem:[#allocation6 + $0x20] sm:$0xff]   ;;  %v579_v15 = vld [vmem:[#allocation6 + $0x18] sm:$0xff]  }
  0x37   :  { %v580_v16 = vld [vmem:[#allocation6 + $0x10] sm:$0xff]   ;;  %v581_v17 = vld [vmem:[#allocation6 + $0x8] sm:$0xff]   ;;  %v582_v18 = vld [vmem:[#allocation6] sm:$0xff]  }
  0x38   :  { %v583_v19 = vld [vmem:[#allocation7 + $0x38] sm:$0xff]   ;;  %v584_v20 = vld [vmem:[#allocation7 + $0x30] sm:$0xff]   ;;  %v585_v33 = vld [vmem:[#allocation7 + $0x28] sm:$0xff]  }
  0x39   :  { %502 = vmatpush3.bf16.msra.mxu0 %v568_v2  ;;  %522 = vmatpush3.bf16.msra.mxu1 %v576_v6  ;;  %v445_v21 = vld [vmem:[%s798_s2] ss:$0 sm:$0xff]  ;;  %v586_v34 = vld [vmem:[#allocation7 + $0x20] sm:$0xff]   ;;  %v588_v36 = vld [vmem:[#allocation7 + $0x10] sm:$0xff]  }
  0x3a   :  { %503 = vmatprep.subr.bf16.mxu0 %v691_v0  ;;  %523 = vmatprep.subr.bf16.mxu1 %v691_v0  ;;  %v587_v35 = vld [vmem:[#allocation7 + $0x18] sm:$0xff]   ;;  %v589_v37 = vld [vmem:[#allocation7 + $0x8] sm:$0xff]   ;;  %v590_v38 = vld [vmem:[#allocation7] sm:$0xff]  }
  0x3b   :  { %v454_v39 = vld [vmem:[%s800_s4] ss:$0 sm:$0xff] }
  0x3c   :  { %v463_v51 = vld [vmem:[%s802_s6] ss:$0 sm:$0xff] }
  0x3d   :  { %504 = vmatpush3.bf16.msra.mxu0 %v569_v3  ;;  %524 = vmatpush3.bf16.msra.mxu1 %v577_v13 }
  0x3e   :  { %505 = vmatprep.subr.bf16.mxu0 %v691_v0  ;;  %525 = vmatprep.subr.bf16.mxu1 %v691_v0 }
  0x41   :  { %506 = vmatpush3.bf16.msra.mxu0 %v570_v5  ;;  %526 = vmatpush3.bf16.msra.mxu1 %v578_v14 }
  0x42   :  { %507 = vmatprep.subr.bf16.mxu0 %v691_v0  ;;  %527 = vmatprep.subr.bf16.mxu1 %v691_v0 }
  0x45   :  { %508 = vmatpush3.bf16.msra.mxu0 %v571_v7  ;;  %528 = vmatpush3.bf16.msra.mxu1 %v579_v15 }
  0x46   :  { %509 = vmatprep.subr.bf16.mxu0 %v691_v0  ;;  %529 = vmatprep.subr.bf16.mxu1 %v691_v0 }
  0x49   :  { %510 = vmatpush3.bf16.msra.mxu0 %v572_v8  ;;  %530 = vmatpush3.bf16.msra.mxu1 %v580_v16 }
  0x4a   :  { %511 = vmatprep.subr.bf16.mxu0 %v691_v0  ;;  %531 = vmatprep.subr.bf16.mxu1 %v691_v0 }
  0x4d   :  { %512 = vmatpush3.bf16.msra.mxu0 %v573_v9  ;;  %532 = vmatpush3.bf16.msra.mxu1 %v581_v17 }
  0x4e   :  { %513 = vmatprep.subr.bf16.mxu0 %v691_v0  ;;  %533 = vmatprep.subr.bf16.mxu1 %v691_v0 }
  0x51   :  { %514 = vmatpush3.bf16.msra.mxu0 %v574_v10  ;;  %534 = vmatpush3.bf16.msra.mxu1 %v582_v18 }
  0x52   :  { %539 = vmatprep.subr.bf16.mxu0 %v691_v0 }
  0x54   :  { %516 = vmatmul.mubr.bf16.vlgmr.msra.gmra.mxu0 %v81_v12 }
  0x55   :  { %555 = vmatprep.mubr.msk.bf16.mxu0 %vm692_vm0, %v691_v0  ;;  %540 = vmatpush3.bf16.msra.mxu0 %v583_v19 }
  0x56   :  { %541 = vmatprep.subr.bf16.mxu0 %v691_v0 }
  0x59   :  { %542 = vmatpush3.bf16.msra.mxu0 %v584_v20 }
  0x5a   :  { %543 = vmatprep.subr.bf16.mxu0 %v691_v0 }
  0x5d   :  { %544 = vmatpush3.bf16.msra.mxu0 %v585_v33 }
  0x5e   :  { %545 = vmatprep.subr.bf16.mxu0 %v691_v0 }
  0x61   :  { %546 = vmatpush3.bf16.msra.mxu0 %v586_v34 }
  0x62   :  { %547 = vmatprep.subr.bf16.mxu0 %v691_v0 }
  0x65   :  { %548 = vmatpush3.bf16.msra.mxu0 %v587_v35 }
  0x66   :  { %549 = vmatprep.subr.bf16.mxu0 %v691_v0 }
  0x69   :  { %550 = vmatpush3.bf16.msra.mxu0 %v588_v36 }
  0x6a   :  { %551 = vmatprep.subr.bf16.mxu0 %v691_v0 }
  0x6d   :  { %552 = vmatpush3.bf16.msra.mxu0 %v589_v37 }
  0x6e   :  { %553 = vmatprep.subr.bf16.mxu0 %v691_v0 }
  0x71   :  { %554 = vmatpush3.bf16.msra.mxu0 %v590_v38 }
 0x114   :  { %v187_v22 = vpop.f32.mrf.mxu0 }
 0x115   :  { %v188_v23 = vadd.f32 %v445_v21, %v187_v22 }
 0x116   :  { %v517_v24 = vpop.f32.mrf.mxu0 }
 0x117   :  { %v194_v25 = vmul.f32 0.70710677, %v188_v23  ;;  %v193_v29 = vmul.f32 0.5, %v188_v23 }
 0x118   :  { %v190_v26 = vpop.f32.mrf.mxu0 }
 0x119   :  { %591 = verf.f32 %v194_v25 }
 0x11a   :  { %v518_v27 = vpop.f32.mrf.mxu0 }
 0x126   :  { %v592_v28 = vpop.eup %591 }
 0x127   :  { %v196_v30 = vadd.f32 1.0, %v592_v28 }
 0x129   :  { %v197_v31 = vmul.f32 %v196_v30, %v193_v29 }
 0x12b   :  { %v198_v32 = vpack.c.bf16 %v197_v31, %v197_v31 }
 0x12d   :  { %536 = vmatmul.mubr.bf16.vlgmr.msra.gmra.mxu1 %v198_v32 }
 0x1ed   :  { %v304_v40 = vpop.f32.mrf.mxu1 }
 0x1ee   :  { %v305_v41 = vadd.f32 %v454_v39, %v304_v40 }
 0x1ef   :  { %v537_v42 = vpop.f32.mrf.mxu1 }
 0x1f0   :  { %v311_v43 = vmul.f32 0.70710677, %v305_v41  ;;  %v310_v47 = vmul.f32 0.5, %v305_v41 }
 0x1f1   :  { %v307_v44 = vpop.f32.mrf.mxu1 }
 0x1f2   :  { %593 = verf.f32 %v311_v43 }
 0x1f3   :  { %v538_v45 = vpop.f32.mrf.mxu1 }
 0x1ff   :  { %v594_v46 = vpop.eup %593 }
 0x200   :  { %v313_v48 = vadd.f32 1.0, %v594_v46 }
 0x202   :  { %v314_v49 = vmul.f32 %v313_v48, %v310_v47 }
 0x204   :  { %v315_v50 = vpack.c.bf16 %v314_v49, %v314_v49 }
 0x206   :  { %556 = vmatmul.mubr.bf16.vlgmr.msra.gmra.mxu0 %v315_v50 }
 0x2c6   :  { %v421_v52 = vpop.f32.mrf.mxu0 }
 0x2c7   :  { %v422_v53 = vadd.f32 %v463_v51, %v421_v52 }
 0x2c8   :  { %v557_v54 = vpop.f32.mrf.mxu0 }
 0x2c9   :  { %427 = vmax.xlane.f32.xlu0 %v422_v53 }
 0x2ca   :  { %v424_v55 = vpop.f32.mrf.mxu0 }
 0x2cc   :  { %v558_v56 = vpop.f32.mrf.mxu0 }
 0x352   :  { %v428_v57 = vpop.xlane.xlu0 %427 }
 0x353   :  { %v429_v58 = vsub.f32 %v422_v53, %v428_v57 }
 0x355   :  { %v430_v59 = vmul.f32 1.442695, %v429_v58 }
 0x357   :  { %595 = vpow2.f32 %v430_v59 }
 0x364   :  { %v596_v60 = vpop.eup %595 }
 0x365   :  { %432 = vadd.xlane.f32.xlu0 %v596_v60 }
 0x3ee   :  { %v433_v61 = vpop.xlane.xlu0 %432 }
 0x3ef   :  { %597 = vrcp.f32 %v433_v61 }
 0x3fc   :  { %v598_v62 = vpop.eup %597 }
 0x3fd   :  { %v435_v63 = vmul.f32 %v598_v62, %v596_v60 }
 0x3ff   :  { %437 = vst.msk [vmem:[%s803_s7] sm:$0xff] %vm436_vm1, %v435_v63 }
 0x400   :  { %442 = vsyncpa [#allocation3], 1 }
 0x401   :  { %443 = vsyncpa [#allocation5], 1 }
 0x402   :  { %444 = vsyncpa [#allocation8], 1 }

// kernel: tpu_custom_call.1
= control target key start
LH: loop header
LB: loop body
LE: loop exit
PB: predicated region body
PF: predicated region fallthrough
CT: control target
= control target key end

     0   :  { %12 = vsyncpa [#allocation3], 0  ;;  %s796_s0 = inlined_call_operand.hbm [shape: f32[8,128], index: 0, kind: input, shape index: {}]   ;;  %s797_s1 = inlined_call_operand.hbm [shape: bf16[128,128], index: 1, kind: input, shape index: {}]   ;;  %s798_s2 = inlined_call_operand.vmem [shape: f32[1,128], index: 2, kind: input, shape index: {}]   ;;  %s799_s3 = inlined_call_operand.hbm [shape: bf16[128,128], index: 3, kind: input, shape index: {}]   ;;  %s800_s4 = inlined_call_operand.vmem [shape: f32[1,128], index: 4, kind: input, shape index: {}]   ;;  %s801_s5 = inlined_call_operand.hbm [shape: bf16[128,128], index: 5, kind: input, shape index: {}]   ;;  %s802_s6 = inlined_call_operand.vmem [shape: f32[1,128], index: 6, kind: input, shape index: {}]   ;;  %s803_s7 = inlined_call_operand.vmem [shape: f32[8,4], index: 7, kind: output, shape index: {}]  }
   0x1   :  { %13 = vsyncpa [#allocation5], 0 }
   0x2   :  { %14 = vsyncpa [#allocation8], 0  ;;  %s685_s24 = smov [#allocation4]  }
   0x3   :  { %s30_s25 = sshll.u32 %s685_s24, 4  ;;  %s31_s25 = int_to_ptr.vmem [resolvable:$true] %s30_s25 }
   0x4   :  { %s607_s26 = scalar_lea.vmem %s31_s25, 1024  ;;  %p612_p1 = scmp.lt.s32.totalorder %s31_s25, %s31_s25 }
   0x5   :  { %p608_p0 = scmp.ne.s32.totalorder %s31_s25, %s607_s26  ;;  %p613_p2 = scmp.lt.s32.totalorder %s607_s26, %s607_s26 }
   0x7   :  { %p614_p3 = por %p613_p2, %p612_p1 }
   0x9   :  { %p615_p4 = pnand %p614_p3, %p608_p0 }
   0xb   :  { %618 = shalt.err (!%p615_p4)
}
   0xc   :  { %s686_s27 = smov 64   ;;  %s687_s28 = smov 4  }
   0xd   :  { %36 = dma.hbm_to_vmem [thread:$0]  %s797_s1, 1024, %s31_s25, [#allocation5], %s686_s27, %s686_s27, %s687_s28  }
   0xe   :  { %s688_s8 = smov [#allocation2]   ;;  %s689_s10 = smov [#allocation6]  }
   0xf   :  { %s21_s9 = sshll.u32 %s688_s8, 4  ;;  %s44_s11 = sshll.u32 %s689_s10, 4  ;;  %s22_s9 = int_to_ptr.vmem [resolvable:$true] %s21_s9  ;;  %s45_s11 = int_to_ptr.vmem [resolvable:$true] %s44_s11 }
  0x10   :  { %s627_s12 = scalar_lea.vmem %s22_s9, 128  ;;  %p632_p6 = scmp.lt.s32.totalorder %s22_s9, %s22_s9 }
  0x11   :  { %p628_p5 = scmp.ne.s32.totalorder %s22_s9, %s627_s12  ;;  %p633_p7 = scmp.lt.s32.totalorder %s627_s12, %s627_s12 }
  0x13   :  { %p634_p8 = por %p633_p7, %p632_p6 }
  0x15   :  { %p635_p9 = pnand %p634_p8, %p628_p5 }
  0x17   :  { %638 = shalt.err (!%p635_p9)
}
  0x18   :  { %24 = dma.hbm_to_vmem [thread:$0]  %s796_s0, 128, %s22_s9, [#allocation3]  }
  0x19   :  { %s647_s15 = scalar_lea.vmem %s45_s11, 1024  ;;  %p652_p11 = scmp.lt.s32.totalorder %s45_s11, %s45_s11 }
  0x1a   :  { %p648_p10 = scmp.ne.s32.totalorder %s45_s11, %s647_s15  ;;  %p653_p12 = scmp.lt.s32.totalorder %s647_s15, %s647_s15 }
  0x1c   :  { %p654_p13 = por %p653_p12, %p652_p11 }
  0x1e   :  { %p655_p0 = pnand %p654_p13, %p648_p10 }
  0x20   :  { %658 = shalt.err (!%p655_p0)
}
  0x21   :  { %50 = dma.hbm_to_vmem [thread:$0]  %s799_s3, 1024, %s45_s11, [#allocation5], %s686_s27, %s686_s27, %s687_s28  }
  0x22   :  { %s690_s17 = smov [#allocation7]  }
  0x23   :  { %s58_s18 = sshll.u32 %s690_s17, 4  ;;  %s59_s18 = int_to_ptr.vmem [resolvable:$true] %s58_s18 }
  0x24   :  { %s667_s19 = scalar_lea.vmem %s59_s18, 1024  ;;  %p672_p2 = scmp.lt.s32.totalorder %s59_s18, %s59_s18 }
  0x25   :  { %p668_p1 = scmp.ne.s32.totalorder %s59_s18, %s667_s19  ;;  %p673_p3 = scmp.lt.s32.totalorder %s667_s19, %s667_s19 }
  0x27   :  { %p674_p4 = por %p673_p3, %p672_p2 }
  0x29   :  { %p675_p5 = pnand %p674_p4, %p668_p1 }
  0x2b   :  { %678 = shalt.err (!%p675_p5)
}
  0x2c   :  { %64 = dma.hbm_to_vmem [thread:$0]  %s801_s5, 1024, %s59_s18, [#allocation8], %s686_s27, %s686_s27, %s687_s28  }
  0x2d   :  { %679 = dma.done.wait [#allocation3], 128  }
  0x2e   :  { %680 = vsyncadd [#allocation3], 4294967168 }
  0x2f   :  { %681 = dma.done.wait [#allocation5], 2048  }
  0x30   :  { %682 = vsyncadd [#allocation5], 4294965248 }
  0x31   :  { %683 = dma.done.wait [#allocation8], 1024  }
  0x32   :  { %684 = vsyncadd [#allocation8], 4294966272  ;;  %v691_v0 = vmov 0.0   ;;  %vm692_vm0 = vmmov 0   ;;  %v567_v1 = vld [vmem:[#allocation4 + $0x38] sm:$0xff]   ;;  %v568_v2 = vld [vmem:[#allocation4 + $0x30] sm:$0xff]  }
  0x33   :  { %499 = vmatprep.subr.bf16.mxu0 %v691_v0  ;;  %515 = vmatprep.mubr.msk.bf16.mxu0 %vm692_vm0, %v691_v0  ;;  %v569_v3 = vld [vmem:[#allocation4 + $0x28] sm:$0xff]   ;;  %v575_v4 = vld [vmem:[#allocation6 + $0x38] sm:$0xff]   ;;  %v570_v5 = vld [vmem:[#allocation4 + $0x20] sm:$0xff]   ;;  %vm436_vm1 = vcmask 31744  }
  0x34   :  { %519 = vmatprep.subr.bf16.mxu1 %v691_v0  ;;  %535 = vmatprep.mubr.msk.bf16.mxu1 %vm692_vm0, %v691_v0  ;;  %v576_v6 = vld [vmem:[#allocation6 + $0x30] sm:$0xff]   ;;  %v571_v7 = vld [vmem:[#allocation4 + $0x18] sm:$0xff]   ;;  %v573_v9 = vld [vmem:[#allocation4 + $0x8] sm:$0xff]  }
  0x35   :  { %500 = vmatpush3.bf16.msra.mxu0 %v567_v1  ;;  %520 = vmatpush3.bf16.msra.mxu1 %v575_v4  ;;  %v572_v8 = vld [vmem:[#allocation4 + $0x10] sm:$0xff]   ;;  %v574_v10 = vld [vmem:[#allocation4] sm:$0xff]   ;;  %v80_v11 = vld [vmem:[#allocation2] sm:$0xff] }
  0x36   :  { %501 = vmatprep.subr.bf16.mxu0 %v691_v0  ;;  %521 = vmatprep.subr.bf16.mxu1 %v691_v0  ;;  %v81_v12 = vpack.c.bf16 %v80_v11, %v80_v11  ;;  %v577_v13 = vld [vmem:[#allocation6 + $0x28] sm:$0xff]   ;;  %v578_v14 = vld [vmem:[#allocation6 + $0x20] sm:$0xff]   ;;  %v579_v15 = vld [vmem:[#allocation6 + $0x18] sm:$0xff]  }
  0x37   :  { %v580_v16 = vld [vmem:[#allocation6 + $0x10] sm:$0xff]   ;;  %v581_v17 = vld [vmem:[#allocation6 + $0x8] sm:$0xff]   ;;  %v582_v18 = vld [vmem:[#allocation6] sm:$0xff]  }
  0x38   :  { %v583_v19 = vld [vmem:[#allocation7 + $0x38] sm:$0xff]   ;;  %v584_v20 = vld [vmem:[#allocation7 + $0x30] sm:$0xff]   ;;  %v585_v33 = vld [vmem:[#allocation7 + $0x28] sm:$0xff]  }
  0x39   :  { %502 = vmatpush3.bf16.msra.mxu0 %v568_v2  ;;  %522 = vmatpush3.bf16.msra.mxu1 %v576_v6  ;;  %v445_v21 = vld [vmem:[%s798_s2] ss:$0 sm:$0xff]  ;;  %v586_v34 = vld [vmem:[#allocation7 + $0x20] sm:$0xff]   ;;  %v588_v36 = vld [vmem:[#allocation7 + $0x10] sm:$0xff]  }
  0x3a   :  { %503 = vmatprep.subr.bf16.mxu0 %v691_v0  ;;  %523 = vmatprep.subr.bf16.mxu1 %v691_v0  ;;  %v587_v35 = vld [vmem:[#allocation7 + $0x18] sm:$0xff]   ;;  %v589_v37 = vld [vmem:[#allocation7 + $0x8] sm:$0xff]   ;;  %v590_v38 = vld [vmem:[#allocation7] sm:$0xff]  }
  0x3b   :  { %v454_v39 = vld [vmem:[%s800_s4] ss:$0 sm:$0xff] }
  0x3c   :  { %v463_v51 = vld [vmem:[%s802_s6] ss:$0 sm:$0xff] }
  0x3d   :  { %504 = vmatpush3.bf16.msra.mxu0 %v569_v3  ;;  %524 = vmatpush3.bf16.msra.mxu1 %v577_v13 }
  0x3e   :  { %505 = vmatprep.subr.bf16.mxu0 %v691_v0  ;;  %525 = vmatprep.subr.bf16.mxu1 %v691_v0 }
  0x41   :  { %506 = vmatpush3.bf16.msra.mxu0 %v570_v5  ;;  %526 = vmatpush3.bf16.msra.mxu1 %v578_v14 }
  0x42   :  { %507 = vmatprep.subr.bf16.mxu0 %v691_v0  ;;  %527 = vmatprep.subr.bf16.mxu1 %v691_v0 }
  0x45   :  { %508 = vmatpush3.bf16.msra.mxu0 %v571_v7  ;;  %528 = vmatpush3.bf16.msra.mxu1 %v579_v15 }
  0x46   :  { %509 = vmatprep.subr.bf16.mxu0 %v691_v0  ;;  %529 = vmatprep.subr.bf16.mxu1 %v691_v0 }
  0x49   :  { %510 = vmatpush3.bf16.msra.mxu0 %v572_v8  ;;  %530 = vmatpush3.bf16.msra.mxu1 %v580_v16 }
  0x4a   :  { %511 = vmatprep.subr.bf16.mxu0 %v691_v0  ;;  %531 = vmatprep.subr.bf16.mxu1 %v691_v0 }
  0x4d   :  { %512 = vmatpush3.bf16.msra.mxu0 %v573_v9  ;;  %532 = vmatpush3.bf16.msra.mxu1 %v581_v17 }
  0x4e   :  { %513 = vmatprep.subr.bf16.mxu0 %v691_v0  ;;  %533 = vmatprep.subr.bf16.mxu1 %v691_v0 }
  0x51   :  { %514 = vmatpush3.bf16.msra.mxu0 %v574_v10  ;;  %534 = vmatpush3.bf16.msra.mxu1 %v582_v18 }
  0x52   :  { %539 = vmatprep.subr.bf16.mxu0 %v691_v0 }
  0x54   :  { %516 = vmatmul.mubr.bf16.vlgmr.msra.gmra.mxu0 %v81_v12 }
  0x55   :  { %555 = vmatprep.mubr.msk.bf16.mxu0 %vm692_vm0, %v691_v0  ;;  %540 = vmatpush3.bf16.msra.mxu0 %v583_v19 }
  0x56   :  { %541 = vmatprep.subr.bf16.mxu0 %v691_v0 }
  0x59   :  { %542 = vmatpush3.bf16.msra.mxu0 %v584_v20 }
  0x5a   :  { %543 = vmatprep.subr.bf16.mxu0 %v691_v0 }
  0x5d   :  { %544 = vmatpush3.bf16.msra.mxu0 %v585_v33 }
  0x5e   :  { %545 = vmatprep.subr.bf16.mxu0 %v691_v0 }
  0x61   :  { %546 = vmatpush3.bf16.msra.mxu0 %v586_v34 }
  0x62   :  { %547 = vmatprep.subr.bf16.mxu0 %v691_v0 }
  0x65   :  { %548 = vmatpush3.bf16.msra.mxu0 %v587_v35 }
  0x66   :  { %549 = vmatprep.subr.bf16.mxu0 %v691_v0 }
  0x69   :  { %550 = vmatpush3.bf16.msra.mxu0 %v588_v36 }
  0x6a   :  { %551 = vmatprep.subr.bf16.mxu0 %v691_v0 }
  0x6d   :  { %552 = vmatpush3.bf16.msra.mxu0 %v589_v37 }
  0x6e   :  { %553 = vmatprep.subr.bf16.mxu0 %v691_v0 }
  0x71   :  { %554 = vmatpush3.bf16.msra.mxu0 %v590_v38 }
 0x114   :  { %v187_v22 = vpop.f32.mrf.mxu0 }
 0x115   :  { %v188_v23 = vadd.f32 %v445_v21, %v187_v22 }
 0x116   :  { %v517_v24 = vpop.f32.mrf.mxu0 }
 0x117   :  { %v194_v25 = vmul.f32 0.70710677, %v188_v23  ;;  %v193_v29 = vmul.f32 0.5, %v188_v23 }
 0x118   :  { %v190_v26 = vpop.f32.mrf.mxu0 }
 0x119   :  { %591 = verf.f32 %v194_v25 }
 0x11a   :  { %v518_v27 = vpop.f32.mrf.mxu0 }
 0x126   :  { %v592_v28 = vpop.eup %591 }
 0x127   :  { %v196_v30 = vadd.f32 1.0, %v592_v28 }
 0x129   :  { %v197_v31 = vmul.f32 %v196_v30, %v193_v29 }
 0x12b   :  { %v198_v32 = vpack.c.bf16 %v197_v31, %v197_v31 }
 0x12d   :  { %536 = vmatmul.mubr.bf16.vlgmr.msra.gmra.mxu1 %v198_v32 }
 0x1ed   :  { %v304_v40 = vpop.f32.mrf.mxu1 }
 0x1ee   :  { %v305_v41 = vadd.f32 %v454_v39, %v304_v40 }
 0x1ef   :  { %v537_v42 = vpop.f32.mrf.mxu1 }
 0x1f0   :  { %v311_v43 = vmul.f32 0.70710677, %v305_v41  ;;  %v310_v47 = vmul.f32 0.5, %v305_v41 }
 0x1f1   :  { %v307_v44 = vpop.f32.mrf.mxu1 }
 0x1f2   :  { %593 = verf.f32 %v311_v43 }
 0x1f3   :  { %v538_v45 = vpop.f32.mrf.mxu1 }
 0x1ff   :  { %v594_v46 = vpop.eup %593 }
 0x200   :  { %v313_v48 = vadd.f32 1.0, %v594_v46 }
 0x202   :  { %v314_v49 = vmul.f32 %v313_v48, %v310_v47 }
 0x204   :  { %v315_v50 = vpack.c.bf16 %v314_v49, %v314_v49 }
 0x206   :  { %556 = vmatmul.mubr.bf16.vlgmr.msra.gmra.mxu0 %v315_v50 }
 0x2c6   :  { %v421_v52 = vpop.f32.mrf.mxu0 }
 0x2c7   :  { %v422_v53 = vadd.f32 %v463_v51, %v421_v52 }
 0x2c8   :  { %v557_v54 = vpop.f32.mrf.mxu0 }
 0x2c9   :  { %427 = vmax.xlane.f32.xlu0 %v422_v53 }
 0x2ca   :  { %v424_v55 = vpop.f32.mrf.mxu0 }
 0x2cc   :  { %v558_v56 = vpop.f32.mrf.mxu0 }
 0x352   :  { %v428_v57 = vpop.xlane.xlu0 %427 }
 0x353   :  { %v429_v58 = vsub.f32 %v422_v53, %v428_v57 }
 0x355   :  { %v430_v59 = vmul.f32 1.442695, %v429_v58 }
 0x357   :  { %595 = vpow2.f32 %v430_v59 }
 0x364   :  { %v596_v60 = vpop.eup %595 }
 0x365   :  { %432 = vadd.xlane.f32.xlu0 %v596_v60 }
 0x3ee   :  { %v433_v61 = vpop.xlane.xlu0 %432 }
 0x3ef   :  { %597 = vrcp.f32 %v433_v61 }
 0x3fc   :  { %v598_v62 = vpop.eup %597 }
 0x3fd   :  { %v435_v63 = vmul.f32 %v598_v62, %v596_v60 }
 0x3ff   :  { %437 = vst.msk [vmem:[%s803_s7] sm:$0xff] %vm436_vm1, %v435_v63 }
 0x400   :  { %442 = vsyncpa [#allocation3], 1 }
 0x401   :  { %443 = vsyncpa [#allocation5], 1 }
 0x402   :  { %444 = vsyncpa [#allocation8], 1 }

</bundles_post_ra>
